<compile_context>
chip_gen: v6e
topology: v6e:2x2x1
jax: 0.10.0
libtpu: 0.0.40
codegen_flags: <defaults>
</compile_context>

<pallas_src>
import jax
import jax.numpy as jnp
from jax.experimental import pallas as pl
from jax.experimental.pallas import tpu as pltpu


def conv_mixer_kernel(xcol_ref, w_ref, b_ref, o_ref):
    # xcol_ref: (B_blk, HW, K)  im2col'd activations (K = KH*KW*C), bf16
    # w_ref:    (K, C)          block-diagonal dense weights, bf16
    # b_ref:    (1, C)          bias, f32
    # o_ref:    (B_blk, HW, C)  output (input dtype, f32 here)
    B, HW, C = o_ref.shape
    K = w_ref.shape[0]
    # Merge batch into the matmul M dimension.  Layout-free because the last
    # dim is unchanged and HW (200) is a multiple of 8 sublanes.
    x = xcol_ref[...].reshape(B * HW, K)
    acc = jnp.dot(x, w_ref[...], preferred_element_type=jnp.float32)
    acc = acc + b_ref[...]                       # single f32 bias add
    o_ref[...] = acc.reshape(B, HW, C).astype(o_ref.dtype)


def _im2col(x_nhwc, KH, KW):
    """(N, H, W, C) -> (N, H*W, KH*KW*C), tap order (ky, kx, c)."""
    N, H, W, C = x_nhwc.shape
    ph, pw = KH // 2, KW // 2
    xp = jnp.pad(x_nhwc, ((0, 0), (ph, ph), (pw, pw), (0, 0)))
    cols = [xp[:, ky:ky + H, kx:kx + W, :]
            for ky in range(KH) for kx in range(KW)]
    return jnp.concatenate(cols, axis=-1).reshape(N, H * W, KH * KW * C)


def _pick_batch_block(N, HW, K, C, in_bytes=2, out_bytes=4,
                      max_rows=2048, vmem_budget=24 << 20):
    """Images per grid step.

    Bounds: (a) per-dot M tile rows (vreg pressure), (b) double-buffered
    VMEM working set of the pipelined blocks, (c) keep >= 2 grid steps when
    possible (v7x megacore), (d) divide N evenly.
    """
    per_img = 2 * HW * (K * in_bytes + C * out_bytes)   # x2 = double buffer
    b_rows = max(1, max_rows // max(HW, 1))
    b_vmem = max(1, vmem_budget // max(per_img, 1))
    b = max(1, min(N, b_rows, b_vmem))
    if N >= 2:
        b = max(1, min(b, N // 2))
    while N % b:
        b -= 1
    return max(b, 1)


def conv_mixer_forward(x, w_dense, bias, input_shape,
                       compute_dtype=jnp.bfloat16):
    """x: (N, HW, C) -> (N, HW, C). w_dense: (KH, KW, C, C), bias: (C,)."""
    H, W = input_shape
    N, HW, C = x.shape
    assert HW == H * W
    KH, KW = w_dense.shape[0], w_dense.shape[1]
    K = KH * KW * C
    in_bytes = jnp.dtype(compute_dtype).itemsize
    out_bytes = jnp.dtype(x.dtype).itemsize

    # Glue (plain JAX): layout change + im2col + dtype cast.
    x_col = _im2col(x.reshape(N, H, W, C), KH, KW).astype(compute_dtype)
    w_flat = w_dense.reshape(K, C).astype(compute_dtype)
    b2 = bias.reshape(1, C).astype(jnp.float32)

    B_blk = _pick_batch_block(N, HW, K, C, in_bytes, out_bytes)
    grid = (N // B_blk,)

    # Only raise the scoped-VMEM limit when the chosen block actually needs
    # more than the most conservative default (16 MiB on v5e).
    est_vmem = (2 * B_blk * HW * K * in_bytes          # x_col block, dbl-buf
                + 2 * B_blk * HW * C * out_bytes       # out block, dbl-buf
                + K * C * in_bytes + 4 * C             # resident weight+bias
                + (2 << 20))                           # slack
    vmem_limit = int(min(est_vmem, 56 << 20)) if est_vmem > (16 << 20) else None

    cost = pl.CostEstimate(
        flops=2 * N * HW * K * C,
        transcendentals=0,
        bytes_accessed=(N * HW * K * in_bytes + K * C * in_bytes
                        + 4 * C + N * HW * C * out_bytes),
    )

    out = pl.pallas_call(
        conv_mixer_kernel,
        out_shape=jax.ShapeDtypeStruct((N, HW, C), x.dtype),
        grid_spec=pltpu.PrefetchScalarGridSpec(
            num_scalar_prefetch=0,
            grid=grid,
            in_specs=[
                pl.BlockSpec((B_blk, HW, K), lambda n: (n, 0, 0)),
                pl.BlockSpec((K, C), lambda n: (0, 0)),
                pl.BlockSpec((1, C), lambda n: (0, 0)),
            ],
            out_specs=pl.BlockSpec((B_blk, HW, C), lambda n: (n, 0, 0)),
        ),
        compiler_params=pltpu.CompilerParams(
            dimension_semantics=("parallel",),
            vmem_limit_bytes=vmem_limit),
        cost_estimate=cost,
    )(x_col, w_flat, b2)
    return out


def make_params(key, embed_dims, num_heads, local_k):
    """Deterministic synthetic params matching nn.Conv2d(groups=num_heads)."""
    KH, KW = local_k
    C = embed_dims
    G = num_heads
    Cg = C // G
    kw_key, b_key = jax.random.split(key)
    # PyTorch grouped conv weight: (C_out, C_in/groups, KH, KW)
    w = jax.random.normal(kw_key, (C, Cg, KH, KW), jnp.float32) * 0.1
    b = jax.random.normal(b_key, (C,), jnp.float32) * 0.1
    # Build block-diagonal dense weight: (KH, KW, C_in, C_out)
    w_dense = jnp.zeros((KH, KW, C, C), jnp.float32)
    for g in range(G):
        blk = w[g * Cg:(g + 1) * Cg]                    # (Cg_out, Cg_in, KH, KW)
        w_dense = w_dense.at[:, :, g * Cg:(g + 1) * Cg,
                             g * Cg:(g + 1) * Cg].set(
            jnp.transpose(blk, (2, 3, 1, 0)))           # -> (KH, KW, Cg_in, Cg_out)
    return w, b, w_dense


def reference_forward(x, w, b, num_heads, input_shape):
    """Pure-JAX reference mirroring the PyTorch module (NCHW grouped conv)."""
    H, W = input_shape
    N, HW, C = x.shape
    KH, KW = w.shape[2], w.shape[3]
    x_nchw = jnp.transpose(x, (0, 2, 1)).reshape(N, C, H, W)
    y = jax.lax.conv_general_dilated(
        x_nchw, w, window_strides=(1, 1),
        padding=((KH // 2, KH // 2), (KW // 2, KW // 2)),
        feature_group_count=num_heads,
        dimension_numbers=("NCHW", "OIHW", "NCHW"))
    y = y + b.reshape(1, C, 1, 1)
    return jnp.transpose(y.reshape(N, C, H * W), (0, 2, 1))


if __name__ == "__main__":
    # Small, module-consistent shapes: default input_shape [8, 25], 8 heads.
    N = 2
    embed_dims = 32
    num_heads = 8
    input_shape = (8, 25)
    local_k = (3, 3)
    H, W = input_shape

    key = jax.random.PRNGKey(0)
    x_key, p_key = jax.random.split(key)
    x = jax.random.normal(x_key, (N, H * W, embed_dims), jnp.float32)

    w_torch, bias, w_dense = make_params(p_key, embed_dims, num_heads, local_k)

    out = conv_mixer_forward(x, w_dense, bias, input_shape)
    out = jax.block_until_ready(out)

    # Reference uses the same bf16-rounded activations/weights (cast back to
    # f32), so the only remaining difference vs the kernel is accumulation
    # order -- keeps the tolerance meaningful despite the bf16 compute path.
    x_bf = x.astype(jnp.bfloat16).astype(jnp.float32)
    w_bf = w_torch.astype(jnp.bfloat16).astype(jnp.float32)
    ref = reference_forward(x_bf, w_bf, bias, num_heads, input_shape)

    assert out.shape == (N, H * W, embed_dims)
    assert jnp.allclose(out, ref, atol=1e-2, rtol=1e-2), \
        float(jnp.max(jnp.abs(out - ref)))

    print("KERNEL_OK")
</pallas_src>

<mosaic_0001>
module attributes {stable_mosaic.version = 11 : i64} {
  func.func @conv_mixer_kernel(%arg0: i32, %arg1: memref<1x200x288xbf16, #tpu.memory_space<vmem>>, %arg2: memref<288x32xbf16, #tpu.memory_space<vmem>>, %arg3: memref<1x32xf32, #tpu.memory_space<vmem>>, %arg4: memref<1x200x32xf32, #tpu.memory_space<vmem>>) attributes {dimension_semantics = [#tpu.dimension_semantics<parallel>], iteration_bounds = array<i64: 2>, scalar_prefetch = 0 : i64, scratch_operands = 0 : i64, tpu.core_type = #tpu.core_type<tc>, window_params = [{transform_indices = @transform_0, window_bounds = array<i64: 1, 200, 288>}, {pipeline_mode = #tpu.pipeline_mode<synchronous>, transform_indices = @transform_1, window_bounds = array<i64: 288, 32>}, {pipeline_mode = #tpu.pipeline_mode<synchronous>, transform_indices = @transform_2, window_bounds = array<i64: 1, 32>}, {transform_indices = @transform_3, window_bounds = array<i64: 1, 200, 32>}]} {
    %c0 = arith.constant 0 : index
    %c0_0 = arith.constant 0 : index
    %c0_1 = arith.constant 0 : index
    %0 = vector.load %arg1[%c0, %c0_0, %c0_1] : memref<1x200x288xbf16, #tpu.memory_space<vmem>>, vector<1x200x288xbf16>
    %1 = vector.shape_cast %0 : vector<1x200x288xbf16> to vector<200x288xbf16>
    %c0_2 = arith.constant 0 : index
    %c0_3 = arith.constant 0 : index
    %2 = vector.load %arg2[%c0_2, %c0_3] : memref<288x32xbf16, #tpu.memory_space<vmem>>, vector<288x32xbf16>
    %cst = arith.constant dense<0.000000e+00> : vector<200x32xf32>
    %3 = tpu.matmul %1, %2, %cst {dimension_numbers = #tpu.dot_dimension_numbers<[1], [0], [0], [1], [0, 0, 1, 1], [], []>} : vector<200x288xbf16>, vector<288x32xbf16>, vector<200x32xf32> -> vector<200x32xf32>
    %c0_4 = arith.constant 0 : index
    %c0_5 = arith.constant 0 : index
    %4 = vector.load %arg3[%c0_4, %c0_5] : memref<1x32xf32, #tpu.memory_space<vmem>>, vector<1x32xf32>
    %5 = vector.broadcast %4 : vector<1x32xf32> to vector<200x32xf32>
    %6 = arith.addf %3, %5 : vector<200x32xf32>
    %7 = vector.shape_cast %6 : vector<200x32xf32> to vector<1x200x32xf32>
    %c0_6 = arith.constant 0 : index
    %c0_7 = arith.constant 0 : index
    %c0_8 = arith.constant 0 : index
    %8 = vector.load %arg4[%c0_6, %c0_7, %c0_8] : memref<1x200x32xf32, #tpu.memory_space<vmem>>, vector<1x200x32xf32>
    tpu.vector_store %arg4[%c0_6, %c0_7, %c0_8], %7 {strides = array<i32>} : memref<1x200x32xf32, #tpu.memory_space<vmem>>, vector<1x200x32xf32>,
    return
  }
  func.func @transform_0(%arg0: i32) -> (i32, i32, i32) {
    %c0_i32 = arith.constant 0 : i32
    %c0_i32_0 = arith.constant 0 : i32
    %c0_i32_1 = arith.constant 0 : i32
    return %arg0, %c0_i32, %c0_i32_0 : i32, i32, i32
  }
  func.func @transform_1(%arg0: i32) -> (i32, i32) {
    %c0_i32 = arith.constant 0 : i32
    %c0_i32_0 = arith.constant 0 : i32
    %c0_i32_1 = arith.constant 0 : i32
    return %c0_i32, %c0_i32_0 : i32, i32
  }
  func.func @transform_2(%arg0: i32) -> (i32, i32) {
    %c0_i32 = arith.constant 0 : i32
    %c0_i32_0 = arith.constant 0 : i32
    %c0_i32_1 = arith.constant 0 : i32
    return %c0_i32, %c0_i32_0 : i32, i32
  }
  func.func @transform_3(%arg0: i32) -> (i32, i32, i32) {
    %c0_i32 = arith.constant 0 : i32
    %c0_i32_0 = arith.constant 0 : i32
    %c0_i32_1 = arith.constant 0 : i32
    return %arg0, %c0_i32, %c0_i32_0 : i32, i32, i32
  }
}

</mosaic_0001>

<bundles_post_ra>
// kernel: tpu_custom_call.1
= control target key start
LH: loop header
LB: loop body
LE: loop exit
PB: predicated region body
PF: predicated region fallthrough
CT: control target
= control target key end

     0   :  { %s1311_s12 = smov 0   ;;  %s1549_s0 = inlined_call_operand.vmem [shape: bf16[2,200,288], index: 0, kind: input, shape index: {}]   ;;  %s1550_s1 = inlined_call_operand.vmem [shape: bf16[288,32], index: 1, kind: input, shape index: {}]   ;;  %s1551_s2 = inlined_call_operand.vmem [shape: f32[1,32], index: 2, kind: input, shape index: {}]   ;;  %s1552_s3 = inlined_call_operand.vmem [shape: f32[2,200,32], index: 3, kind: output, shape index: {}]  }
   0x1 LB: > { %s955_s13 = sadd.s32 4294967295, %s1287_s12   ;;  %p959_p0 = scmp.ge.s32.totalorder %s1287_s12, 1  ;;  %s1287_s12 = sphi %s1311_s12, %s13_s12  }
   0x2   : > { %p137_p1 = scmp.lt.s32.totalorder %s1287_s12, 3 }
   0x4   : > { %p138_p2 = pnand %p959_p0, %p137_p1 }
   0x5   : > { %p161_p3 = scmp.lt.s32.totalorder (!%p138_p2), %s955_s13, 1 }
   0x6   : > { %141 = sbr.rel (%p138_p2) target bundleno = 342 (0x156), region = 32 }
   0xb   : > { %v1212_v0 = vld [vmem:[%s1550_s1 + $0x78] sm:$0xff]   ;;  %v1289_v2 = vmov 0.0   ;;  %v1214_v3 = vld [vmem:[%s1550_s1 + $0x70] sm:$0xff]   ;;  %vm1290_vm0 = vmmov 0   ;;  %v1216_v5 = vld [vmem:[%s1550_s1 + $0x68] sm:$0xff]   ;;  %s1554_s13 = smov (!%p161_p3, %s955_s13), 1 }
   0xc   : > { %v1213_v1 = vld [vmem:[%s1550_s1 + $0x38] sm:$0xff]   ;;  %1144 = vmatprep.subr.bf16.mxu1 %v1289_v2  ;;  %1035 = vmatprep.subr.bf16.mxu0 %v1212_v0  ;;  %v1215_v4 = vld [vmem:[%s1550_s1 + $0x30] sm:$0xff]   ;;  %v1217_v6 = vld [vmem:[%s1550_s1 + $0x28] sm:$0xff]   ;;  %s1200_s5 = smul.u32 300, %s1554_s13  ;;  %vm563_vm1 = vcmask 261120  }
   0xd   : > { %1148 = vmatprep.mubr.msk.bf16.mxu1 %vm1290_vm0, %v1289_v2  ;;  %1036 = vmatpush3.bf16.msra.mxu0 %v1213_v1  ;;  %v1218_v7 = vld [vmem:[%s1550_s1 + $0x60] sm:$0xff]   ;;  %v1220_v9 = vld [vmem:[%s1550_s1 + $0x58] sm:$0xff]   ;;  %v1224_v10 = vld [vmem:[%s1550_s1 + $0x88] sm:$0xff]   ;;  %s1201_s29 = smul.u32 200, %s1554_s13 }
   0xe   : > { %1037 = vmatprep.subr.bf16.mxu0 %v1214_v3  ;;  %v1219_v8 = vld [vmem:[%s1550_s1 + $0x20] sm:$0xff]   ;;  %v1221_v11 = vld [vmem:[%s1550_s1 + $0x18] sm:$0xff]   ;;  %1145 = vmatpush3.bf16.msra.mxu1 %v1224_v10  ;;  %s1365_s16 = scalar_lea.vmem %s1549_s0, %s1200_s5  ;;  %v1222_v13 = vld [vmem:[%s1550_s1 + $0x50] sm:$0xff]  }
   0xf   : > { %1146 = vmatprep.subr.bf16.mxu1 %v1289_v2  ;;  %v1227_v12 = vld [vmem:[%s1550_s1 + $0x80] sm:$0xff]   ;;  %v1223_v14 = vld [vmem:[%s1550_s1 + $0x10] sm:$0xff]   ;;  %v1225_v16 = vld [vmem:[%s1550_s1 + $0x48] sm:$0xff]   ;;  %s1470_s7 = scalar_lea.vmem %s1552_s3, %s1201_s29 }
  0x10   : > { %v1230_v15 = vld [vmem:[%s1365_s16 + $0x8] ss:$12 sps:$4 sm:$0xff]   ;;  %v1233_v17 = vld [vmem:[%s1365_s16 + $0x4] ss:$12 sps:$4 sm:$0xff]   ;;  %v1234_v20 = vld [vmem:[%s1365_s16 + $0x20] ss:$12 sps:$4 sm:$0xff]  }
  0x11   : > { %1038 = vmatpush3.bf16.msra.mxu0 %v1215_v4  ;;  %635 = vmatprep.mubr.bf16.mxu0 %v1233_v17  ;;  %v1226_v18 = vld [vmem:[%s1550_s1 + $0x8] sm:$0xff]   ;;  %v1228_v19 = vld [vmem:[%s1550_s1 + $0x40] sm:$0xff]   ;;  %v1242_v27 = vld [vmem:[%s1365_s16 + $0x50] ss:$12 sps:$4 sm:$0xff]  }
  0x12   : > { %1039 = vmatprep.subr.bf16.mxu0 %v1216_v5  ;;  %1147 = vmatpush3.bf16.msra.mxu1 %v1227_v12  ;;  %v1229_v21 = vld [vmem:[%s1550_s1] sm:$0xff]   ;;  %v1235_v23 = vld [vmem:[%s1365_s16 + $0x1c] ss:$12 sps:$4 sm:$0xff]   ;;  %v1243_v29 = vld [vmem:[%s1365_s16 + $0x4c] ss:$12 sps:$4 sm:$0xff]  }
  0x13   : > { %v1231_v22 = vld [vmem:[%s1365_s16] ss:$12 sps:$4 sm:$0xff]   ;;  %v1238_v24 = vld [vmem:[%s1365_s16 + $0x38] ss:$12 sps:$4 sm:$0xff]   ;;  %v1241_v28 = vld [vmem:[%s1365_s16 + $0x30] ss:$12 sps:$4 sm:$0xff]  }
  0x14   : > { %v1237_v25 = vld [vmem:[%s1365_s16 + $0x18] ss:$12 sps:$4 sm:$0xff]   ;;  %v1239_v26 = vld [vmem:[%s1365_s16 + $0x34] ss:$12 sps:$4 sm:$0xff]   ;;  %v1251_v35 = vld [vmem:[%s1365_s16 + $0x7c] ss:$12 sps:$4 sm:$0xff]  }
  0x15   : > { %1040 = vmatpush3.bf16.msra.mxu0 %v1217_v6  ;;  %1149 = vmatmul.mubr.msk.bf16.vlgmr.msra.gmra.mxu1 %vm563_vm1, %v1230_v15  ;;  %v1246_v30 = vld [vmem:[%s1365_s16 + $0x68] ss:$12 sps:$4 sm:$0xff]   ;;  %v1247_v32 = vld [vmem:[%s1365_s16 + $0x64] ss:$12 sps:$4 sm:$0xff]   ;;  %v1250_v33 = vld [vmem:[%s1365_s16 + $0x80] ss:$12 sps:$4 sm:$0xff]  }
  0x16   : > { %1041 = vmatprep.subr.bf16.mxu0 %v1218_v7  ;;  %1152 = vmatprep.mubr.msk.bf16.mxu1 %vm1290_vm0, %v1289_v2  ;;  %v1245_v31 = vld [vmem:[%s1365_s16 + $0x48] ss:$12 sps:$4 sm:$0xff]   ;;  %v1249_v34 = vld [vmem:[%s1365_s16 + $0x60] ss:$12 sps:$4 sm:$0xff]   ;;  %v1254_v36 = vld [vmem:[%s1365_s16 + $0x98] ss:$12 sps:$4 sm:$0xff]  }
  0x17   : > { %v1253_v37 = vld [vmem:[%s1365_s16 + $0x78] ss:$12 sps:$4 sm:$0xff]   ;;  %v1255_v38 = vld [vmem:[%s1365_s16 + $0x94] ss:$12 sps:$4 sm:$0xff]   ;;  %v1258_v39 = vld [vmem:[%s1365_s16 + $0xb0] ss:$12 sps:$4 sm:$0xff]  }
  0x18   : > { %v1257_v40 = vld [vmem:[%s1365_s16 + $0x90] ss:$12 sps:$4 sm:$0xff]   ;;  %v1259_v41 = vld [vmem:[%s1365_s16 + $0xac] ss:$12 sps:$4 sm:$0xff]   ;;  %v1262_v42 = vld [vmem:[%s1365_s16 + $0xc8] ss:$12 sps:$4 sm:$0xff]  }
  0x19   : > { %1042 = vmatpush3.bf16.msra.mxu0 %v1219_v8  ;;  %v1261_v43 = vld [vmem:[%s1365_s16 + $0xa8] ss:$12 sps:$4 sm:$0xff]   ;;  %v1263_v44 = vld [vmem:[%s1365_s16 + $0xc4] ss:$12 sps:$4 sm:$0xff]   ;;  %v1266_v45 = vld [vmem:[%s1365_s16 + $0xe0] ss:$12 sps:$4 sm:$0xff]  }
  0x1a   : > { %1043 = vmatprep.subr.bf16.mxu0 %v1220_v9  ;;  %v1265_v46 = vld [vmem:[%s1365_s16 + $0xc0] ss:$12 sps:$4 sm:$0xff]   ;;  %v1267_v47 = vld [vmem:[%s1365_s16 + $0xdc] ss:$12 sps:$4 sm:$0xff]   ;;  %v1270_v48 = vld [vmem:[%s1365_s16 + $0xf8] ss:$12 sps:$4 sm:$0xff]  }
  0x1b   : > { %v1269_v49 = vld [vmem:[%s1365_s16 + $0xd8] ss:$12 sps:$4 sm:$0xff]   ;;  %v1271_v50 = vld [vmem:[%s1365_s16 + $0xf4] ss:$12 sps:$4 sm:$0xff]   ;;  %v1274_v51 = vld [vmem:[%s1365_s16 + $0x110] ss:$12 sps:$4 sm:$0xff]  }
  0x1c   : > { %v1273_v52 = vld [vmem:[%s1365_s16 + $0xf0] ss:$12 sps:$4 sm:$0xff]   ;;  %v1275_v53 = vld [vmem:[%s1365_s16 + $0x10c] ss:$12 sps:$4 sm:$0xff]   ;;  %v1278_v54 = vld [vmem:[%s1365_s16 + $0x128] ss:$0 sps:$4 sm:$0xff]  }
  0x1d   : > { %1044 = vmatpush3.bf16.msra.mxu0 %v1221_v11  ;;  %1153 = vmatmul.mubr.msk.bf16.gmra.mxu1 %vm563_vm1, %v1234_v20  ;;  %v220_v55 = vld [vmem:[%s1365_s16 + $0x120] sm:$0xff]  ;;  %v1277_v56 = vld [vmem:[%s1365_s16 + $0x108] ss:$12 sps:$4 sm:$0xff]  }
  0x1e   : > { %1045 = vmatprep.subr.bf16.mxu0 %v1222_v13  ;;  %1156 = vmatprep.mubr.msk.bf16.mxu1 %vm1290_vm0, %v1289_v2  ;;  %v1000_v57 = vcombine.high %v220_v55, %v220_v55  ;;  %v999_v58 = vcombine.low %v220_v55, %v220_v55  ;;  %v1464_v4 = vld [vmem:[%s1551_s2] ss:$0 sm:$0xff] }
  0x21   : > { %1046 = vmatpush3.bf16.msra.mxu0 %v1223_v14 }
  0x22   : > { %1047 = vmatprep.subr.bf16.mxu0 %v1225_v16 }
  0x25   : > { %1048 = vmatpush3.bf16.msra.mxu0 %v1226_v18  ;;  %1157 = vmatmul.mubr.msk.bf16.gmra.mxu1 %vm563_vm1, %v1238_v24 }
  0x26   : > { %1049 = vmatprep.subr.bf16.mxu0 %v1228_v19  ;;  %1160 = vmatprep.mubr.msk.bf16.mxu1 %vm1290_vm0, %v1289_v2 }
  0x29   : > { %1050 = vmatpush3.bf16.msra.mxu0 %v1229_v21 }
  0x2c   : > { %636 = vmatmul.mubr.bf16.vlgmr.msra.gmra.mxu0 %v1231_v22 }
  0x2d   : > { %643 = vmatprep.mubr.bf16.mxu0 %v1235_v23  ;;  %1161 = vmatmul.mubr.msk.bf16.gmra.mxu1 %vm563_vm1, %v1242_v27 }
  0x2e   : > { %1164 = vmatprep.mubr.msk.bf16.mxu1 %vm1290_vm0, %v1289_v2 }
  0x34   : > { %644 = vmatmul.mubr.bf16.gmra.mxu0 %v1237_v25 }
  0x35   : > { %651 = vmatprep.mubr.bf16.mxu0 %v1239_v26  ;;  %1165 = vmatmul.mubr.msk.bf16.gmra.mxu1 %vm563_vm1, %v1246_v30 }
  0x36   : > { %1168 = vmatprep.mubr.msk.bf16.mxu1 %vm1290_vm0, %v1289_v2 }
  0x3c   : > { %652 = vmatmul.mubr.bf16.gmra.mxu0 %v1241_v28 }
  0x3d   : > { %659 = vmatprep.mubr.bf16.mxu0 %v1243_v29  ;;  %1169 = vmatmul.mubr.msk.bf16.gmra.mxu1 %vm563_vm1, %v1250_v33 }
  0x3e   : > { %1172 = vmatprep.mubr.msk.bf16.mxu1 %vm1290_vm0, %v1289_v2 }
  0x44   : > { %660 = vmatmul.mubr.bf16.gmra.mxu0 %v1245_v31 }
  0x45   : > { %667 = vmatprep.mubr.bf16.mxu0 %v1247_v32  ;;  %1173 = vmatmul.mubr.msk.bf16.gmra.mxu1 %vm563_vm1, %v1254_v36 }
  0x46   : > { %1176 = vmatprep.mubr.msk.bf16.mxu1 %vm1290_vm0, %v1289_v2 }
  0x4c   : > { %668 = vmatmul.mubr.bf16.gmra.mxu0 %v1249_v34 }
  0x4d   : > { %675 = vmatprep.mubr.bf16.mxu0 %v1251_v35  ;;  %1177 = vmatmul.mubr.msk.bf16.gmra.mxu1 %vm563_vm1, %v1258_v39 }
  0x4e   : > { %1180 = vmatprep.mubr.msk.bf16.mxu1 %vm1290_vm0, %v1289_v2 }
  0x54   : > { %676 = vmatmul.mubr.bf16.gmra.mxu0 %v1253_v37 }
  0x55   : > { %683 = vmatprep.mubr.bf16.mxu0 %v1255_v38  ;;  %1181 = vmatmul.mubr.msk.bf16.gmra.mxu1 %vm563_vm1, %v1262_v42 }
  0x56   : > { %1184 = vmatprep.mubr.msk.bf16.mxu1 %vm1290_vm0, %v1289_v2 }
  0x5c   : > { %684 = vmatmul.mubr.bf16.gmra.mxu0 %v1257_v40 }
  0x5d   : > { %691 = vmatprep.mubr.bf16.mxu0 %v1259_v41  ;;  %1185 = vmatmul.mubr.msk.bf16.gmra.mxu1 %vm563_vm1, %v1266_v45 }
  0x5e   : > { %1188 = vmatprep.mubr.msk.bf16.mxu1 %vm1290_vm0, %v1289_v2 }
  0x64   : > { %692 = vmatmul.mubr.bf16.gmra.mxu0 %v1261_v43 }
  0x65   : > { %699 = vmatprep.mubr.bf16.mxu0 %v1263_v44  ;;  %1189 = vmatmul.mubr.msk.bf16.gmra.mxu1 %vm563_vm1, %v1270_v48 }
  0x66   : > { %1192 = vmatprep.mubr.msk.bf16.mxu1 %vm1290_vm0, %v1289_v2 }
  0x6c   : > { %700 = vmatmul.mubr.bf16.gmra.mxu0 %v1265_v46 }
  0x6d   : > { %707 = vmatprep.mubr.bf16.mxu0 %v1267_v47  ;;  %1193 = vmatmul.mubr.msk.bf16.gmra.mxu1 %vm563_vm1, %v1274_v51 }
  0x6e   : > { %1196 = vmatprep.mubr.msk.bf16.mxu1 %vm1290_vm0, %v1289_v2 }
  0x74   : > { %708 = vmatmul.mubr.bf16.gmra.mxu0 %v1269_v49 }
  0x75   : > { %715 = vmatprep.mubr.bf16.mxu0 %v1271_v50  ;;  %1197 = vmatmul.mubr.msk.bf16.gmra.mxu1 %vm563_vm1, %v1278_v54 }
  0x7c   : > { %716 = vmatmul.mubr.bf16.gmra.mxu0 %v1273_v52 }
  0x7d   : > { %723 = vmatprep.mubr.bf16.mxu0 %v1275_v53 }
  0x84   : > { %724 = vmatmul.mubr.bf16.gmra.mxu0 %v1277_v56 }
  0x85   : > { %731 = vmatprep.mubr.bf16.mxu0 %v1000_v57 }
  0x8c   : > { %732 = vmatmul.mubr.bf16.gmra.mxu0 %v999_v58 }
  0xd5   : > { %v773_v59 = vpop.f32.mrf.mxu1 }
  0xd7   : > { %v1150_v60 = vpop.f32.mrf.mxu1 }
  0xd9   : > { %v776_v61 = vpop.f32.mrf.mxu1 }
  0xdb   : > { %v1151_v62 = vpop.f32.mrf.mxu1 }
  0xdd   : > { %v781_v63 = vpop.f32.mrf.mxu1 }
  0xdf   : > { %v1154_v0 = vpop.f32.mrf.mxu1 }
  0xe1   : > { %v784_v1 = vpop.f32.mrf.mxu1 }
  0xe3   : > { %v1155_v3 = vpop.f32.mrf.mxu1 }
  0xe5   : > { %v789_v7 = vpop.f32.mrf.mxu1 }
  0xe7   : > { %v1158_v10 = vpop.f32.mrf.mxu1 }
  0xe9   : > { %v792_v14 = vpop.f32.mrf.mxu1 }
  0xeb   : > { %v1159_v17 = vpop.f32.mrf.mxu1 }
  0xec   : > { %v1051_v2 = vpop.f32.mrf.mxu0 }
  0xed   : > { %v797_v21 = vpop.f32.mrf.mxu1 }
  0xee   : > { %v1052_v5 = vpop.f32.mrf.mxu0 }
  0xef   : > { %v1053_v6 = vadd.f32 %v1052_v5, %v1051_v2  ;;  %v1162_v24 = vpop.f32.mrf.mxu1 }
  0xf0   : > { %v1054_v8 = vpop.f32.mrf.mxu0 }
  0xf1   : > { %v638_v9 = vadd.f32 %v1053_v6, %v1464_v4  ;;  %v800_v28 = vpop.f32.mrf.mxu1 }
  0xf2   : > { %v1055_v11 = vpop.f32.mrf.mxu0 }
  0xf3   : > { %v774_v12 = vadd.f32 %v773_v59, %v638_v9  ;;  %v1056_v13 = vadd.f32 %v1055_v11, %v1054_v8  ;;  %v1163_v31 = vpop.f32.mrf.mxu1 }
  0xf4   : > { %v1057_v15 = vpop.f32.mrf.mxu0 }
  0xf5   : > { %875 = vst.msk [vmem:[%s1470_s7] sm:$0xff] %vm563_vm1, %v774_v12  ;;  %v641_v16 = vadd.f32 %v1056_v13, %v1464_v4  ;;  %v805_v35 = vpop.f32.mrf.mxu1 }
  0xf6   : > { %v1058_v18 = vpop.f32.mrf.mxu0 }
  0xf7   : > { %v777_v19 = vadd.f32 %v776_v61, %v641_v16  ;;  %v1059_v20 = vadd.f32 %v1058_v18, %v1057_v15  ;;  %v1166_v38 = vpop.f32.mrf.mxu1 }
  0xf8   : > { %v1060_v22 = vpop.f32.mrf.mxu0 }
  0xf9   : > { %876 = vst.msk [vmem:[%s1470_s7 + $0x8] sm:$0xff] %vm563_vm1, %v777_v19  ;;  %v646_v23 = vadd.f32 %v1059_v20, %v1464_v4  ;;  %v808_v42 = vpop.f32.mrf.mxu1 }
  0xfa   : > { %v1061_v25 = vpop.f32.mrf.mxu0 }
  0xfb   : > { %v782_v26 = vadd.f32 %v781_v63, %v646_v23  ;;  %v1062_v27 = vadd.f32 %v1061_v25, %v1060_v22  ;;  %v1167_v45 = vpop.f32.mrf.mxu1 }
  0xfc   : > { %v1063_v29 = vpop.f32.mrf.mxu0 }
  0xfd   : > { %877 = vst.msk [vmem:[%s1470_s7 + $0x10] sm:$0xff] %vm563_vm1, %v782_v26  ;;  %v649_v30 = vadd.f32 %v1062_v27, %v1464_v4  ;;  %v813_v49 = vpop.f32.mrf.mxu1 }
  0xfe   : > { %v1064_v32 = vpop.f32.mrf.mxu0 }
  0xff   : > { %v785_v33 = vadd.f32 %v784_v1, %v649_v30  ;;  %v1065_v34 = vadd.f32 %v1064_v32, %v1063_v29  ;;  %v1170_v52 = vpop.f32.mrf.mxu1 }
 0x100   : > { %v1066_v36 = vpop.f32.mrf.mxu0 }
 0x101   : > { %878 = vst.msk [vmem:[%s1470_s7 + $0x18] sm:$0xff] %vm563_vm1, %v785_v33  ;;  %v654_v37 = vadd.f32 %v1065_v34, %v1464_v4  ;;  %v816_v56 = vpop.f32.mrf.mxu1 }
 0x102   : > { %v1067_v39 = vpop.f32.mrf.mxu0 }
 0x103   : > { %v790_v40 = vadd.f32 %v789_v7, %v654_v37  ;;  %v1068_v41 = vadd.f32 %v1067_v39, %v1066_v36  ;;  %v1171_v59 = vpop.f32.mrf.mxu1 }
 0x104   : > { %v1069_v43 = vpop.f32.mrf.mxu0 }
 0x105   : > { %879 = vst.msk [vmem:[%s1470_s7 + $0x20] sm:$0xff] %vm563_vm1, %v790_v40  ;;  %v657_v44 = vadd.f32 %v1068_v41, %v1464_v4  ;;  %v821_v63 = vpop.f32.mrf.mxu1 }
 0x106   : > { %v1070_v46 = vpop.f32.mrf.mxu0 }
 0x107   : > { %v793_v47 = vadd.f32 %v792_v14, %v657_v44  ;;  %v1071_v48 = vadd.f32 %v1070_v46, %v1069_v43  ;;  %v1174_v2 = vpop.f32.mrf.mxu1 }
 0x108   : > { %v1072_v50 = vpop.f32.mrf.mxu0 }
 0x109   : > { %880 = vst.msk [vmem:[%s1470_s7 + $0x28] sm:$0xff] %vm563_vm1, %v793_v47  ;;  %v662_v51 = vadd.f32 %v1071_v48, %v1464_v4  ;;  %v824_v7 = vpop.f32.mrf.mxu1 }
 0x10a   : > { %v1073_v53 = vpop.f32.mrf.mxu0 }
 0x10b   : > { %v798_v54 = vadd.f32 %v797_v21, %v662_v51  ;;  %v1074_v55 = vadd.f32 %v1073_v53, %v1072_v50  ;;  %v1175_v10 = vpop.f32.mrf.mxu1 }
 0x10c   : > { %v1075_v57 = vpop.f32.mrf.mxu0 }
 0x10d   : > { %881 = vst.msk [vmem:[%s1470_s7 + $0x30] sm:$0xff] %vm563_vm1, %v798_v54  ;;  %v665_v58 = vadd.f32 %v1074_v55, %v1464_v4  ;;  %v829_v14 = vpop.f32.mrf.mxu1 }
 0x10e   : > { %v1076_v60 = vpop.f32.mrf.mxu0 }
 0x10f   : > { %v801_v61 = vadd.f32 %v800_v28, %v665_v58  ;;  %v1077_v62 = vadd.f32 %v1076_v60, %v1075_v57  ;;  %v1178_v17 = vpop.f32.mrf.mxu1 }
 0x110   : > { %v1078_v0 = vpop.f32.mrf.mxu0 }
 0x111   : > { %882 = vst.msk [vmem:[%s1470_s7 + $0x38] sm:$0xff] %vm563_vm1, %v801_v61  ;;  %v670_v1 = vadd.f32 %v1077_v62, %v1464_v4  ;;  %v832_v21 = vpop.f32.mrf.mxu1 }
 0x112   : > { %v1079_v3 = vpop.f32.mrf.mxu0 }
 0x113   : > { %v806_v5 = vadd.f32 %v805_v35, %v670_v1  ;;  %v1080_v6 = vadd.f32 %v1079_v3, %v1078_v0  ;;  %v1179_v24 = vpop.f32.mrf.mxu1 }
 0x114   : > { %v1081_v8 = vpop.f32.mrf.mxu0 }
 0x115   : > { %883 = vst.msk [vmem:[%s1470_s7 + $0x40] sm:$0xff] %vm563_vm1, %v806_v5  ;;  %v673_v9 = vadd.f32 %v1080_v6, %v1464_v4  ;;  %v837_v28 = vpop.f32.mrf.mxu1 }
 0x116   : > { %v1082_v11 = vpop.f32.mrf.mxu0 }
 0x117   : > { %v809_v12 = vadd.f32 %v808_v42, %v673_v9  ;;  %v1083_v13 = vadd.f32 %v1082_v11, %v1081_v8  ;;  %v1182_v31 = vpop.f32.mrf.mxu1 }
 0x118   : > { %v1084_v15 = vpop.f32.mrf.mxu0 }
 0x119   : > { %884 = vst.msk [vmem:[%s1470_s7 + $0x48] sm:$0xff] %vm563_vm1, %v809_v12  ;;  %v678_v16 = vadd.f32 %v1083_v13, %v1464_v4  ;;  %v840_v35 = vpop.f32.mrf.mxu1 }
 0x11a   : > { %v1085_v18 = vpop.f32.mrf.mxu0 }
 0x11b   : > { %v814_v19 = vadd.f32 %v813_v49, %v678_v16  ;;  %v1086_v20 = vadd.f32 %v1085_v18, %v1084_v15  ;;  %v1183_v38 = vpop.f32.mrf.mxu1 }
 0x11c   : > { %v1087_v22 = vpop.f32.mrf.mxu0 }
 0x11d   : > { %885 = vst.msk [vmem:[%s1470_s7 + $0x50] sm:$0xff] %vm563_vm1, %v814_v19  ;;  %v681_v23 = vadd.f32 %v1086_v20, %v1464_v4  ;;  %v845_v42 = vpop.f32.mrf.mxu1 }
 0x11e   : > { %v1088_v25 = vpop.f32.mrf.mxu0 }
 0x11f   : > { %v817_v26 = vadd.f32 %v816_v56, %v681_v23  ;;  %v1089_v27 = vadd.f32 %v1088_v25, %v1087_v22  ;;  %v1186_v45 = vpop.f32.mrf.mxu1 }
 0x120   : > { %v1090_v29 = vpop.f32.mrf.mxu0 }
 0x121   : > { %886 = vst.msk [vmem:[%s1470_s7 + $0x58] sm:$0xff] %vm563_vm1, %v817_v26  ;;  %v686_v30 = vadd.f32 %v1089_v27, %v1464_v4  ;;  %v848_v49 = vpop.f32.mrf.mxu1 }
 0x122   : > { %v1091_v32 = vpop.f32.mrf.mxu0 }
 0x123   : > { %v822_v33 = vadd.f32 %v821_v63, %v686_v30  ;;  %v1092_v34 = vadd.f32 %v1091_v32, %v1090_v29  ;;  %v1187_v52 = vpop.f32.mrf.mxu1 }
 0x124   : > { %v1093_v36 = vpop.f32.mrf.mxu0 }
 0x125   : > { %887 = vst.msk [vmem:[%s1470_s7 + $0x60] sm:$0xff] %vm563_vm1, %v822_v33  ;;  %v689_v37 = vadd.f32 %v1092_v34, %v1464_v4  ;;  %v853_v56 = vpop.f32.mrf.mxu1 }
 0x126   : > { %v1094_v39 = vpop.f32.mrf.mxu0 }
 0x127   : > { %v825_v40 = vadd.f32 %v824_v7, %v689_v37  ;;  %v1095_v41 = vadd.f32 %v1094_v39, %v1093_v36  ;;  %v1190_v59 = vpop.f32.mrf.mxu1 }
 0x128   : > { %v1096_v43 = vpop.f32.mrf.mxu0 }
 0x129   : > { %888 = vst.msk [vmem:[%s1470_s7 + $0x68] sm:$0xff] %vm563_vm1, %v825_v40  ;;  %v694_v44 = vadd.f32 %v1095_v41, %v1464_v4  ;;  %v856_v63 = vpop.f32.mrf.mxu1 }
 0x12a   : > { %v1097_v46 = vpop.f32.mrf.mxu0 }
 0x12b   : > { %v830_v47 = vadd.f32 %v829_v14, %v694_v44  ;;  %v1098_v48 = vadd.f32 %v1097_v46, %v1096_v43  ;;  %v1191_v2 = vpop.f32.mrf.mxu1 }
 0x12c   : > { %v1099_v50 = vpop.f32.mrf.mxu0 }
 0x12d   : > { %889 = vst.msk [vmem:[%s1470_s7 + $0x70] sm:$0xff] %vm563_vm1, %v830_v47  ;;  %v697_v51 = vadd.f32 %v1098_v48, %v1464_v4  ;;  %v861_v7 = vpop.f32.mrf.mxu1 }
 0x12e   : > { %v1100_v53 = vpop.f32.mrf.mxu0 }
 0x12f   : > { %v833_v54 = vadd.f32 %v832_v21, %v697_v51  ;;  %v1101_v55 = vadd.f32 %v1100_v53, %v1099_v50  ;;  %v1194_v10 = vpop.f32.mrf.mxu1 }
 0x130   : > { %v1102_v57 = vpop.f32.mrf.mxu0 }
 0x131   : > { %890 = vst.msk [vmem:[%s1470_s7 + $0x78] sm:$0xff] %vm563_vm1, %v833_v54  ;;  %v702_v58 = vadd.f32 %v1101_v55, %v1464_v4  ;;  %v864_v14 = vpop.f32.mrf.mxu1 }
 0x132   : > { %v1103_v60 = vpop.f32.mrf.mxu0 }
 0x133   : > { %v838_v61 = vadd.f32 %v837_v28, %v702_v58  ;;  %v1104_v62 = vadd.f32 %v1103_v60, %v1102_v57  ;;  %v1195_v17 = vpop.f32.mrf.mxu1 }
 0x134   : > { %v1105_v0 = vpop.f32.mrf.mxu0 }
 0x135   : > { %891 = vst.msk [vmem:[%s1470_s7 + $0x80] sm:$0xff] %vm563_vm1, %v838_v61  ;;  %v705_v1 = vadd.f32 %v1104_v62, %v1464_v4  ;;  %v869_v21 = vpop.f32.mrf.mxu1 }
 0x136   : > { %v1106_v3 = vpop.f32.mrf.mxu0 }
 0x137   : > { %v841_v5 = vadd.f32 %v840_v35, %v705_v1  ;;  %v1107_v6 = vadd.f32 %v1106_v3, %v1105_v0  ;;  %v1198_v24 = vpop.f32.mrf.mxu1 }
 0x138   : > { %v1108_v8 = vpop.f32.mrf.mxu0 }
 0x139   : > { %892 = vst.msk [vmem:[%s1470_s7 + $0x88] sm:$0xff] %vm563_vm1, %v841_v5  ;;  %v710_v9 = vadd.f32 %v1107_v6, %v1464_v4  ;;  %v872_v28 = vpop.f32.mrf.mxu1 }
 0x13a   : > { %v1109_v11 = vpop.f32.mrf.mxu0 }
 0x13b   : > { %v846_v12 = vadd.f32 %v845_v42, %v710_v9  ;;  %v1110_v13 = vadd.f32 %v1109_v11, %v1108_v8  ;;  %v1199_v31 = vpop.f32.mrf.mxu1 }
 0x13c   : > { %v1111_v15 = vpop.f32.mrf.mxu0 }
 0x13d   : > { %893 = vst.msk [vmem:[%s1470_s7 + $0x90] sm:$0xff] %vm563_vm1, %v846_v12  ;;  %v713_v16 = vadd.f32 %v1110_v13, %v1464_v4 }
 0x13e   : > { %v1112_v18 = vpop.f32.mrf.mxu0 }
 0x13f   : > { %v849_v19 = vadd.f32 %v848_v49, %v713_v16  ;;  %v1113_v20 = vadd.f32 %v1112_v18, %v1111_v15 }
 0x140   : > { %v1114_v22 = vpop.f32.mrf.mxu0 }
 0x141   : > { %894 = vst.msk [vmem:[%s1470_s7 + $0x98] sm:$0xff] %vm563_vm1, %v849_v19  ;;  %v718_v23 = vadd.f32 %v1113_v20, %v1464_v4 }
 0x142   : > { %v1115_v25 = vpop.f32.mrf.mxu0 }
 0x143   : > { %v854_v26 = vadd.f32 %v853_v56, %v718_v23  ;;  %v1116_v27 = vadd.f32 %v1115_v25, %v1114_v22 }
 0x144   : > { %v1117_v29 = vpop.f32.mrf.mxu0 }
 0x145   : > { %895 = vst.msk [vmem:[%s1470_s7 + $0xa0] sm:$0xff] %vm563_vm1, %v854_v26  ;;  %v721_v30 = vadd.f32 %v1116_v27, %v1464_v4 }
 0x146   : > { %v1118_v32 = vpop.f32.mrf.mxu0 }
 0x147   : > { %v857_v33 = vadd.f32 %v856_v63, %v721_v30  ;;  %v1119_v34 = vadd.f32 %v1118_v32, %v1117_v29 }
 0x148   : > { %v1120_v35 = vpop.f32.mrf.mxu0 }
 0x149   : > { %896 = vst.msk [vmem:[%s1470_s7 + $0xa8] sm:$0xff] %vm563_vm1, %v857_v33  ;;  %v726_v36 = vadd.f32 %v1119_v34, %v1464_v4 }
 0x14a   : > { %v1121_v37 = vpop.f32.mrf.mxu0 }
 0x14b   : > { %v862_v38 = vadd.f32 %v861_v7, %v726_v36  ;;  %v1122_v39 = vadd.f32 %v1121_v37, %v1120_v35 }
 0x14c   : > { %v1123_v40 = vpop.f32.mrf.mxu0 }
 0x14d   : > { %897 = vst.msk [vmem:[%s1470_s7 + $0xb0] sm:$0xff] %vm563_vm1, %v862_v38  ;;  %v729_v41 = vadd.f32 %v1122_v39, %v1464_v4 }
 0x14e   : > { %v1124_v42 = vpop.f32.mrf.mxu0 }
 0x14f   : > { %v865_v43 = vadd.f32 %v864_v14, %v729_v41  ;;  %v1125_v44 = vadd.f32 %v1124_v42, %v1123_v40 }
 0x150   : > { %v1126_v45 = vpop.f32.mrf.mxu0 }
 0x151   : > { %898 = vst.msk [vmem:[%s1470_s7 + $0xb8] sm:$0xff] %vm563_vm1, %v865_v43  ;;  %v734_v46 = vadd.f32 %v1125_v44, %v1464_v4 }
 0x152   : > { %v1127_v47 = vpop.f32.mrf.mxu0 }
 0x153   : > { %v870_v48 = vadd.f32 %v869_v21, %v734_v46 }
 0x155   : > { %899 = vst.msk [vmem:[%s1470_s7 + $0xc0] sm:$0xff] %vm563_vm1, %v870_v48 }
 0x156 PF: > { %s13_s12 = sadd.s32 1, %s1287_s12  }
 0x157   : > { %p10_p4 = scmp.ge.s32.totalorder %s13_s12, 4  }
 0x159   :  { %12 = sbr.rel (!%p10_p4) target bundleno = 1 (0x1), region = 62 }

</bundles_post_ra>
